<compile_context>
chip_gen: v6e
topology: v6e:2x2x1
jax: 0.10.0
libtpu: 0.0.40
codegen_flags: <defaults>
</compile_context>

<pallas_src>
import math

import jax
import jax.numpy as jnp
from jax.experimental import pallas as pl
from jax.experimental.pallas import tpu as pltpu

LEAKY_ALPHA = 0.2        # LeakyReLU negative slope (module's `alpha`)
MASK_FILL = -1e9         # matches torch.masked_fill(..., -1000000000.0)


# ---------------------------------------------------------------------------
# Pass 1: fused projection.
#   h   = x @ W                (emitted in bf16 for the pass-2 MXU)
#   h_i = sum(h * a[:F].T)     (f32, VPU reduction)
#   h_j = sum(h * a[F:].T)     (f32, VPU reduction)
# ---------------------------------------------------------------------------
def project_kernel(x_ref, w_ref, a1t_ref, a2t_ref, h_ref, hi_ref, hj_ref):
    h = jnp.dot(x_ref[...], w_ref[...], preferred_element_type=jnp.float32)
    hi_ref[...] = jnp.sum(h * a1t_ref[...], axis=-1, keepdims=True)   # [TM, 1]
    hj_ref[...] = jnp.sum(h * a2t_ref[...], axis=-1, keepdims=True)   # [TM, 1]
    h_ref[...] = h.astype(jnp.bfloat16)


# ---------------------------------------------------------------------------
# Pass 2: flash-style attention.  grid = (q_blocks, k_blocks), key axis last.
#   hi_ref : [TM, 1]   h_i scores for this query block            (f32)
#   hjT_ref: [1,  TK]  h_j scores for this key block, as a row    (f32)
#   adj_ref: [TM, TK]  int8 adjacency tile (>0 means edge)
#   hk_ref : [TK, F]   key/value rows of h                        (bf16)
#   scratch: m/l [TM,1] f32, acc [TM,F] f32 (online-softmax state)
# ---------------------------------------------------------------------------
def gat_kernel(hi_ref, hjT_ref, adj_ref, hk_ref, out_ref, m_sc, l_sc, acc_sc):
    ki = pl.program_id(1)

    @pl.when(ki == 0)
    def _():
        m_sc[...] = jnp.full(m_sc.shape, -jnp.inf, dtype=m_sc.dtype)
        l_sc[...] = jnp.zeros(l_sc.shape, dtype=l_sc.dtype)
        acc_sc[...] = jnp.zeros(acc_sc.shape, dtype=acc_sc.dtype)

    e = hi_ref[...] + hjT_ref[...]                              # [TM, TK]
    e = jnp.where(e > 0, e, LEAKY_ALPHA * e)                    # LeakyReLU
    e = jnp.where(adj_ref[...] > 0, e, jnp.float32(MASK_FILL))  # masked_fill

    # Online (flash) softmax update.  Masked / padded keys contribute
    # exp(-1e9 - m) == 0 as soon as the row has at least one real edge.
    m_prev = m_sc[...]
    m_new = jnp.maximum(m_prev, jnp.max(e, axis=-1, keepdims=True))
    corr = jnp.exp(m_prev - m_new)                              # [TM, 1]
    p = jnp.exp(e - m_new)                                      # [TM, TK] f32
    l_sc[...] = corr * l_sc[...] + jnp.sum(p, axis=-1, keepdims=True)
    # bf16 x bf16 -> f32 accumulate: fast MXU path on v5e/v6e/v7x.
    acc_sc[...] = corr * acc_sc[...] + jnp.dot(
        p.astype(jnp.bfloat16), hk_ref[...],
        preferred_element_type=jnp.float32)
    m_sc[...] = m_new

    @pl.when(ki == pl.num_programs(1) - 1)
    def _():
        # Normalize AFTER the value matmul: TM*F mults instead of TM*N divides.
        res = acc_sc[...] * pl.reciprocal(l_sc[...], approx=True)
        # ELU (alpha=1); clamp the exp argument so the dead branch can't overflow.
        out_ref[...] = jnp.where(res > 0, res,
                                 jnp.exp(jnp.minimum(res, 0.0)) - 1.0)
    # TODO(synk): nn.Dropout in training mode (random mask) is not reproduced;
    # forward here matches eval-mode behaviour (identity).


def padded_num_nodes(n, block_rows, block_keys):
    tile = math.lcm(block_rows, block_keys)
    return pl.cdiv(n, tile) * tile


def preprocess_adjacency(adj, n_padded):
    """One-time adjacency prep: bool -> int8, pad to [Np, Np].

    The graph ('regist_pos_matrix') is constant across forward calls, so run
    this ONCE and cache the result — re-casting the full f32 NxN matrix every
    call costs more HBM traffic than the attention kernel's whole adjacency
    stream.  Padded rows/columns are zero => fully masked in the kernel.
    """
    n = adj.shape[0]
    pad = n_padded - n
    adj_i8 = (adj > 0).astype(jnp.int8)
    if pad:
        adj_i8 = jnp.pad(adj_i8, ((0, pad), (0, pad)))
    return adj_i8


def graph_attention_forward(x, W, a, adj_i8, *, block_rows=128, block_keys=256,
                            adj_buffers=2):
    """Forward pass of GraphAttentionLayer.

    adj_i8 : int8 [Np, Np] from preprocess_adjacency (entries > 0 mean 'edge').
    block_rows / block_keys : sweep up to 256/512 on v5e/v6e (128 MiB VMEM);
        larger block_rows also amortizes the streamed key/value traffic.
        Keep the number of query blocks >= 4-8 so neither v7x TensorCore idles.
    adj_buffers : adjacency stream depth; 2 hides the DMA on v6e/v7x, use 3 on
        v5e (lower HBM bandwidth).
    Note: a query row with no positive adjacency entry yields a uniform average
    over all (padded) keys, matching the reference's -1e9-fill behaviour up to
    the padded-column count; graphs are expected to carry self-loops.
    """
    N, Din = x.shape
    F = W.shape[1]
    Np = padded_num_nodes(N, block_rows, block_keys)
    assert adj_i8.shape == (Np, Np) and adj_i8.dtype == jnp.int8, (
        "pass the cached output of preprocess_adjacency(adj, padded_num_nodes(...))")
    pad = Np - N

    x_p = jnp.pad(x, ((0, pad), (0, 0))) if pad else x
    a1t = a[:F, :].T                      # [1, F]
    a2t = a[F:, :].T                      # [1, F]

    n_q = Np // block_rows
    n_k = Np // block_keys

    # --- pass 1: h = x @ W (bf16) and the two attention scores (f32) ---
    h_bf16, h_i, h_j = pl.pallas_call(
        project_kernel,
        out_shape=(jax.ShapeDtypeStruct((Np, F), jnp.bfloat16),
                   jax.ShapeDtypeStruct((Np, 1), jnp.float32),
                   jax.ShapeDtypeStruct((Np, 1), jnp.float32)),
        grid_spec=pltpu.PrefetchScalarGridSpec(
            num_scalar_prefetch=0,
            grid=(n_q,),
            in_specs=[
                pl.BlockSpec((block_rows, Din), lambda i: (i, 0)),
                pl.BlockSpec((Din, F), lambda i: (0, 0)),
                pl.BlockSpec((1, F), lambda i: (0, 0)),
                pl.BlockSpec((1, F), lambda i: (0, 0)),
            ],
            out_specs=(
                pl.BlockSpec((block_rows, F), lambda i: (i, 0)),
                pl.BlockSpec((block_rows, 1), lambda i: (i, 0)),
                pl.BlockSpec((block_rows, 1), lambda i: (i, 0)),
            )),
        compiler_params=pltpu.CompilerParams(
            dimension_semantics=("parallel",)),
    )(x_p, W, a1t, a2t)

    # h_j as a [1, Np] row so it broadcasts along the key (lane) axis; this is
    # a tiny (Np floats) wrapper op, not a re-read of h.
    h_jT = h_j.reshape(1, Np)

    # --- pass 2: flash attention over int8 adjacency + bf16 key/value tiles ---
    out_p = pl.pallas_call(
        gat_kernel,
        out_shape=jax.ShapeDtypeStruct((Np, F), jnp.float32),
        grid_spec=pltpu.PrefetchScalarGridSpec(
            num_scalar_prefetch=0,
            grid=(n_q, n_k),
            in_specs=[
                pl.BlockSpec((block_rows, 1), lambda qi, ki: (qi, 0)),     # h_i
                pl.BlockSpec((1, block_keys), lambda qi, ki: (0, ki)),     # h_j.T
                pl.BlockSpec((block_rows, block_keys),                     # adjacency
                             lambda qi, ki: (qi, ki),
                             pipeline_mode=pl.Buffered(adj_buffers)),
                pl.BlockSpec((block_keys, F), lambda qi, ki: (ki, 0)),     # keys/values
            ],
            out_specs=pl.BlockSpec((block_rows, F), lambda qi, ki: (qi, 0)),
            scratch_shapes=[
                pltpu.VMEM((block_rows, 1), jnp.float32),   # m
                pltpu.VMEM((block_rows, 1), jnp.float32),   # l
                pltpu.VMEM((block_rows, F), jnp.float32),   # acc
            ]),
        compiler_params=pltpu.CompilerParams(
            dimension_semantics=("parallel", "arbitrary"),
            vmem_limit_bytes=48 << 20),   # cap; safe on v7x's 64 MiB / TC
    )(h_i, h_jT, adj_i8, h_bf16)

    return out_p[:N] if pad else out_p


def reference_forward(x, W, a, adj, alpha=LEAKY_ALPHA):
    F = W.shape[1]
    h = x @ W
    h_i = h @ a[:F, :]
    h_j = h @ a[F:, :]
    e = h_i + h_j.T
    e = jnp.where(e > 0, e, alpha * e)
    e = jnp.where(adj <= 0, MASK_FILL, e)
    attn = jax.nn.softmax(e, axis=-1)
    res = attn @ h
    return jnp.where(res > 0, res, jnp.exp(jnp.minimum(res, 0.0)) - 1.0)


def xavier_uniform(key, shape, gain):
    fan_in, fan_out = shape[1], shape[0]  # torch convention for 2D tensors
    bound = gain * math.sqrt(6.0 / (fan_in + fan_out))
    return jax.random.uniform(key, shape, jnp.float32, -bound, bound)


if __name__ == "__main__":
    # 'highest' keeps the f32 reference baseline tight; the kernels themselves
    # no longer depend on this flag (all score matmuls are in-kernel f32).
    jax.config.update("jax_default_matmul_precision", "highest")

    # Small, deterministic synthetic problem (4 query blocks x 2 key blocks).
    N, IN_FEATURE, OUT_FEATURE = 512, 32, 64
    BLOCK_ROWS, BLOCK_KEYS = 128, 256       # sweep 256/512 on v5e/v6e
    key = jax.random.PRNGKey(0)
    kx, kw, ka, kadj = jax.random.split(key, 4)

    x = jax.random.normal(kx, (N, IN_FEATURE), jnp.float32)
    W = xavier_uniform(kw, (IN_FEATURE, OUT_FEATURE), gain=1.414)
    a = xavier_uniform(ka, (2 * OUT_FEATURE, 1), gain=1.414)

    # Dense adjacency (stands in for get_value('regist_pos_matrix').to_dense()):
    # random 0/1 edges plus self-loops so every row has at least one neighbour.
    adj = jax.random.bernoulli(kadj, 0.25, (N, N)).astype(jnp.float32)
    adj = jnp.maximum(adj, jnp.eye(N, dtype=jnp.float32))

    # Hoisted out of the per-forward path: the graph is constant across calls,
    # so cast / pad the adjacency once and reuse it.
    Np = padded_num_nodes(N, BLOCK_ROWS, BLOCK_KEYS)
    adj_i8 = jax.block_until_ready(preprocess_adjacency(adj, Np))

    out = graph_attention_forward(x, W, a, adj_i8,
                                  block_rows=BLOCK_ROWS, block_keys=BLOCK_KEYS)
    out = jax.block_until_ready(out)

    ref = reference_forward(x, W, a, adj)
    assert out.shape == (N, OUT_FEATURE)
    max_err = float(jnp.max(jnp.abs(out - ref)))
    # bf16 p/h at the MXU + approx reciprocal -> ~1e-2-level tolerance.
    assert jnp.allclose(out, ref, atol=3e-2, rtol=3e-2), max_err

    print("KERNEL_OK")
</pallas_src>

<mosaic_0001>
module attributes {stable_mosaic.version = 11 : i64} {
  func.func @project_kernel(%arg0: i32, %arg1: memref<128x32xf32, #tpu.memory_space<vmem>>, %arg2: memref<32x64xf32, #tpu.memory_space<vmem>>, %arg3: memref<1x64xf32, #tpu.memory_space<vmem>>, %arg4: memref<1x64xf32, #tpu.memory_space<vmem>>, %arg5: memref<128x64xbf16, #tpu.memory_space<vmem>>, %arg6: memref<128x1xf32, #tpu.memory_space<vmem>>, %arg7: memref<128x1xf32, #tpu.memory_space<vmem>>) attributes {dimension_semantics = [#tpu.dimension_semantics<parallel>], iteration_bounds = array<i64: 4>, scalar_prefetch = 0 : i64, scratch_operands = 0 : i64, tpu.core_type = #tpu.core_type<tc>, window_params = [{transform_indices = @transform_0, window_bounds = array<i64: 128, 32>}, {pipeline_mode = #tpu.pipeline_mode<synchronous>, transform_indices = @transform_1, window_bounds = array<i64: 32, 64>}, {pipeline_mode = #tpu.pipeline_mode<synchronous>, transform_indices = @transform_2, window_bounds = array<i64: 1, 64>}, {pipeline_mode = #tpu.pipeline_mode<synchronous>, transform_indices = @transform_3, window_bounds = array<i64: 1, 64>}, {transform_indices = @transform_4, window_bounds = array<i64: 128, 64>}, {transform_indices = @transform_5, window_bounds = array<i64: 128, 1>}, {transform_indices = @transform_6, window_bounds = array<i64: 128, 1>}]} {
    %c0 = arith.constant 0 : index
    %c0_0 = arith.constant 0 : index
    %0 = vector.load %arg1[%c0, %c0_0] : memref<128x32xf32, #tpu.memory_space<vmem>>, vector<128x32xf32>
    %c0_1 = arith.constant 0 : index
    %c0_2 = arith.constant 0 : index
    %1 = vector.load %arg2[%c0_1, %c0_2] : memref<32x64xf32, #tpu.memory_space<vmem>>, vector<32x64xf32>
    %cst = arith.constant dense<0.000000e+00> : vector<128x64xf32>
    %2 = tpu.matmul %0, %1, %cst {dimension_numbers = #tpu.dot_dimension_numbers<[1], [0], [0], [1], [0, 0, 1, 1], [], []>, precision = #tpu.contract_precision<fp32>} : vector<128x32xf32>, vector<32x64xf32>, vector<128x64xf32> -> vector<128x64xf32>
    %c0_3 = arith.constant 0 : index
    %c0_4 = arith.constant 0 : index
    %3 = vector.load %arg3[%c0_3, %c0_4] : memref<1x64xf32, #tpu.memory_space<vmem>>, vector<1x64xf32>
    %4 = vector.broadcast %3 : vector<1x64xf32> to vector<128x64xf32>
    %5 = arith.mulf %2, %4 : vector<128x64xf32>
    %cst_5 = arith.constant dense<0.000000e+00> : vector<128xf32>
    %6 = vector.multi_reduction <add>, %5, %cst_5 [1] : vector<128x64xf32> to vector<128xf32>
    %7 = vector.shape_cast %6 : vector<128xf32> to vector<128x1xf32>
    %c0_6 = arith.constant 0 : index
    %c0_7 = arith.constant 0 : index
    %8 = vector.load %arg6[%c0_6, %c0_7] : memref<128x1xf32, #tpu.memory_space<vmem>>, vector<128x1xf32>
    tpu.vector_store %arg6[%c0_6, %c0_7], %7 {strides = array<i32>} : memref<128x1xf32, #tpu.memory_space<vmem>>, vector<128x1xf32>,
    %c0_8 = arith.constant 0 : index
    %c0_9 = arith.constant 0 : index
    %9 = vector.load %arg4[%c0_8, %c0_9] : memref<1x64xf32, #tpu.memory_space<vmem>>, vector<1x64xf32>
    %10 = vector.broadcast %9 : vector<1x64xf32> to vector<128x64xf32>
    %11 = arith.mulf %2, %10 : vector<128x64xf32>
    %cst_10 = arith.constant dense<0.000000e+00> : vector<128xf32>
    %12 = vector.multi_reduction <add>, %11, %cst_10 [1] : vector<128x64xf32> to vector<128xf32>
    %13 = vector.shape_cast %12 : vector<128xf32> to vector<128x1xf32>
    %c0_11 = arith.constant 0 : index
    %c0_12 = arith.constant 0 : index
    %14 = vector.load %arg7[%c0_11, %c0_12] : memref<128x1xf32, #tpu.memory_space<vmem>>, vector<128x1xf32>
    tpu.vector_store %arg7[%c0_11, %c0_12], %13 {strides = array<i32>} : memref<128x1xf32, #tpu.memory_space<vmem>>, vector<128x1xf32>,
    %15 = arith.truncf %2 : vector<128x64xf32> to vector<128x64xbf16>
    %c0_13 = arith.constant 0 : index
    %c0_14 = arith.constant 0 : index
    %16 = vector.load %arg5[%c0_13, %c0_14] : memref<128x64xbf16, #tpu.memory_space<vmem>>, vector<128x64xbf16>
    tpu.vector_store %arg5[%c0_13, %c0_14], %15 {strides = array<i32>} : memref<128x64xbf16, #tpu.memory_space<vmem>>, vector<128x64xbf16>,
    return
  }
  func.func @transform_0(%arg0: i32) -> (i32, i32) {
    %c0_i32 = arith.constant 0 : i32
    %c0_i32_0 = arith.constant 0 : i32
    return %arg0, %c0_i32 : i32, i32
  }
  func.func @transform_1(%arg0: i32) -> (i32, i32) {
    %c0_i32 = arith.constant 0 : i32
    %c0_i32_0 = arith.constant 0 : i32
    %c0_i32_1 = arith.constant 0 : i32
    return %c0_i32, %c0_i32_0 : i32, i32
  }
  func.func @transform_2(%arg0: i32) -> (i32, i32) {
    %c0_i32 = arith.constant 0 : i32
    %c0_i32_0 = arith.constant 0 : i32
    %c0_i32_1 = arith.constant 0 : i32
    return %c0_i32, %c0_i32_0 : i32, i32
  }
  func.func @transform_3(%arg0: i32) -> (i32, i32) {
    %c0_i32 = arith.constant 0 : i32
    %c0_i32_0 = arith.constant 0 : i32
    %c0_i32_1 = arith.constant 0 : i32
    return %c0_i32, %c0_i32_0 : i32, i32
  }
  func.func @transform_4(%arg0: i32) -> (i32, i32) {
    %c0_i32 = arith.constant 0 : i32
    %c0_i32_0 = arith.constant 0 : i32
    return %arg0, %c0_i32 : i32, i32
  }
  func.func @transform_5(%arg0: i32) -> (i32, i32) {
    %c0_i32 = arith.constant 0 : i32
    %c0_i32_0 = arith.constant 0 : i32
    return %arg0, %c0_i32 : i32, i32
  }
  func.func @transform_6(%arg0: i32) -> (i32, i32) {
    %c0_i32 = arith.constant 0 : i32
    %c0_i32_0 = arith.constant 0 : i32
    return %arg0, %c0_i32 : i32, i32
  }
}

</mosaic_0001>

<bundles_post_ra>
// kernel: tpu_custom_call.1
= control target key start
LH: loop header
LB: loop body
LE: loop exit
PB: predicated region body
PF: predicated region fallthrough
CT: control target
= control target key end

     0   :  { %s2274_s21 = smov 0   ;;  %s3025_s0 = inlined_call_operand.vmem [shape: f32[512,32], index: 0, kind: input, shape index: {}]   ;;  %s3026_s1 = inlined_call_operand.vmem [shape: f32[32,64], index: 1, kind: input, shape index: {}]   ;;  %s3027_s2 = inlined_call_operand.vmem [shape: f32[1,64], index: 2, kind: input, shape index: {}]   ;;  %s3028_s3 = inlined_call_operand.vmem [shape: f32[1,64], index: 3, kind: input, shape index: {}]   ;;  %s3029_s4 = inlined_call_operand.vmem [shape: bf16[512,64], index: 4, kind: output, shape index: {0}]   ;;  %s3030_s5 = inlined_call_operand.vmem [shape: f32[512,1], index: 5, kind: output, shape index: {1}]   ;;  %s3031_s6 = inlined_call_operand.vmem [shape: f32[512,1], index: 6, kind: output, shape index: {2}]  }
   0x1 LB: > { %s1862_s22 = sadd.s32 4294967295, %s2237_s21   ;;  %p1866_p0 = scmp.ge.s32.totalorder %s2237_s21, 1  ;;  %s2237_s21 = sphi %s2274_s21, %s17_s21  }
   0x2   : > { %p218_p1 = scmp.lt.s32.totalorder %s2237_s21, 5 }
   0x4   : > { %p219_p2 = pnand %p1866_p0, %p218_p1 }
   0x6   : > { %222 = sbr.rel (%p219_p2) target bundleno = 496 (0x1f0), region = 36 }
   0xb   : > { %v301_v0 = vld [vmem:[%s3026_s1 + $0x18] sm:$0xff]  ;;  %v300_v1 = vld [vmem:[%s3026_s1 + $0x10] sm:$0xff]  ;;  %v299_v2 = vld [vmem:[%s3026_s1 + $0x8] sm:$0xff]  ;;  %s1867_s29 = sshll.u32 %s1862_s22, 4  ;;  %vm302_vm0 = vcmask 261120   ;;  %vm1721_vm1 = vcmask 519168  }
   0xc   : > { %v2291_v3 = vand.u32 4294901760, %v301_v0  ;;  %v2293_v4 = vand.u32 4294901760, %v300_v1  ;;  %v2295_v5 = vand.u32 4294901760, %v299_v2  ;;  %v298_v6 = vld [vmem:[%s3026_s1] sm:$0xff]  ;;  %p259_p3 = scmp.lt.s32.totalorder %s1867_s29, 63  ;;  %vm1504_vm2 = vcmask 523264  }
   0xd   : > { %v2300_v7 = vand.u32 4294901760, %v298_v6  ;;  %vm1553_vm3 = vcmask 7168  }
   0xe   : > { %2031 = vmatprep.subr.mxu0 %v2291_v3  ;;  %v2304_v8 = vsub.f32 %v301_v0, %v2291_v3  ;;  %v2307_v9 = vsub.f32 %v300_v1, %v2293_v4  ;;  %v2310_v10 = vsub.f32 %v299_v2, %v2295_v5  ;;  %s3051_s29 = smov (!%p259_p3, %s1867_s29), 63 }
   0xf   : > { %2032 = vmatpush3.msra.mxu0 %v2291_v3  ;;  %v2316_v11 = vsub.f32 %v298_v6, %v2300_v7  ;;  %s2329_s8 = sshll.u32 %s3051_s29, 3  ;;  %s1870_s12 = sshll.u32 %s3051_s29, 2 }
  0x10   : > { %v2319_v12 = vand.u32 4294901760, %v2304_v8  ;;  %2033 = vmatprep.subr.mxu0 %v2293_v4  ;;  %v2323_v13 = vand.u32 4294901760, %v2307_v9  ;;  %v2326_v14 = vand.u32 4294901760, %v2310_v10  ;;  %s2339_s11 = scalar_lea.vmem %s3025_s0, %s2329_s8  ;;  %s2769_s19 = scalar_lea.vmem %s3029_s4, %s1870_s12 }
  0x11   : > { %2034 = vmatpush3.msra.mxu0 %v2293_v4  ;;  %v2333_v15 = vand.u32 4294901760, %v2316_v11  ;;  %v282_v19 = vld [vmem:[%s2339_s11] sm:$0xff]  ;;  %v283_v20 = vld [vmem:[%s2339_s11 + $0x8] sm:$0xff]  ;;  %v284_v21 = vld [vmem:[%s2339_s11 + $0x10] sm:$0xff]  ;;  %s2950_s23 = scalar_lea.vmem %s3031_s6, %s2329_s8  ;;  %s2956_s26 = scalar_lea.vmem %s3030_s5, %s2329_s8 }
  0x12   : > { %v608_v16 = vsub.f32 %v2304_v8, %v2319_v12  ;;  %v615_v17 = vsub.f32 %v2307_v9, %v2323_v13  ;;  %2035 = vmatprep.subr.mxu0 %v2295_v5  ;;  %v622_v18 = vsub.f32 %v2310_v10, %v2326_v14  ;;  %v304_v23 = vsel %vm302_vm0, %v282_v19, 0  ;;  %v285_v26 = vld [vmem:[%s2339_s11 + $0x18] sm:$0xff]  ;;  %v286_v27 = vld [vmem:[%s2339_s11 + $0x20] sm:$0xff]  ;;  %v287_v28 = vld [vmem:[%s2339_s11 + $0x28] sm:$0xff] }
  0x13   : > { %2036 = vmatpush3.msra.mxu0 %v2295_v5  ;;  %v629_v22 = vsub.f32 %v2316_v11, %v2333_v15  ;;  %v307_v24 = vsel %vm302_vm0, %v283_v20, 0  ;;  %v310_v25 = vsel %vm302_vm0, %v284_v21, 0  ;;  %v2361_v32 = vand.u32 4294901760, %v304_v23  ;;  %v288_v37 = vld [vmem:[%s2339_s11 + $0x30] sm:$0xff]  ;;  %v289_v38 = vld [vmem:[%s2339_s11 + $0x38] sm:$0xff]  ;;  %v290_v63 = vld [vmem:[%s2339_s11 + $0x40] sm:$0xff] }
  0x14   : > { %v609_v29 = vand.u32 4294901760, %v608_v16  ;;  %v616_v30 = vand.u32 4294901760, %v615_v17  ;;  %v623_v31 = vand.u32 4294901760, %v622_v18  ;;  %2037 = vmatprep.subr.mxu0 %v2300_v7  ;;  %v2364_v34 = vand.u32 4294901760, %v307_v24  ;;  %v291_v16 = vld [vmem:[%s2339_s11 + $0x48] sm:$0xff]  ;;  %v292_v21 = vld [vmem:[%s2339_s11 + $0x50] sm:$0xff] }
  0x15   : > { %2038 = vmatpush3.msra.mxu0 %v2300_v7  ;;  %v630_v33 = vand.u32 4294901760, %v629_v22  ;;  %v2366_v35 = vand.u32 4294901760, %v310_v25  ;;  %v313_v36 = vsel %vm302_vm0, %v285_v26, 0  ;;  %v2372_v39 = vsub.f32 %v304_v23, %v2361_v32  ;;  %2071 = vmatprep.mubr.f32.mxu1 %v2361_v32  ;;  %v294_v26 = vld [vmem:[%s2339_s11 + $0x60] sm:$0xff] }
  0x16   : > { %2063 = vmatprep.subr.mxu1 %v609_v29  ;;  %v2375_v40 = vand.u32 4294901760, %v313_v36  ;;  %v316_v41 = vsel %vm302_vm0, %v286_v27, 0  ;;  %v319_v42 = vsel %vm302_vm0, %v287_v28, 0  ;;  %2095 = vmatprep.subr.mxu0 %v2304_v8  ;;  %v2381_v43 = vsub.f32 %v307_v24, %v2364_v34 }
  0x17   : > { %2064 = vmatpush3.msra.mxu1 %v609_v29  ;;  %v2384_v44 = vsub.f32 %v310_v25, %v2366_v35  ;;  %v2386_v45 = vand.u32 4294901760, %v316_v41  ;;  %v2388_v46 = vand.u32 4294901760, %v319_v42  ;;  %v422_v47 = vand.u32 4294901760, %v2372_v39  ;;  %v293_v25 = vld [vmem:[%s2339_s11 + $0x58] sm:$0xff] }
  0x18   : > { %2065 = vmatprep.subr.mxu1 %v616_v30  ;;  %v2392_v48 = vsub.f32 %v313_v36, %v2375_v40  ;;  %v322_v49 = vsel %vm302_vm0, %v288_v37, 0  ;;  %v325_v50 = vsel %vm302_vm0, %v289_v38, 0  ;;  %v432_v51 = vand.u32 4294901760, %v2381_v43  ;;  %v295_v38 = vld [vmem:[%s2339_s11 + $0x68] sm:$0xff] }
  0x19   : > { %2066 = vmatpush3.msra.mxu1 %v616_v30  ;;  %v442_v52 = vand.u32 4294901760, %v2384_v44  ;;  %v2399_v53 = vsub.f32 %v316_v41, %v2386_v45  ;;  %v2402_v54 = vsub.f32 %v319_v42, %v2388_v46  ;;  %v423_v55 = vsub.f32 %v2372_v39, %v422_v47 }
  0x1a   : > { %2067 = vmatprep.subr.mxu1 %v623_v31  ;;  %v452_v56 = vand.u32 4294901760, %v2392_v48  ;;  %v2408_v57 = vand.u32 4294901760, %v322_v49  ;;  %v2410_v58 = vand.u32 4294901760, %v325_v50  ;;  %v433_v59 = vsub.f32 %v2381_v43, %v432_v51 }
  0x1b   : > { %2068 = vmatpush3.msra.mxu1 %v623_v31  ;;  %v443_v60 = vsub.f32 %v2384_v44, %v442_v52  ;;  %v462_v61 = vand.u32 4294901760, %v2399_v53  ;;  %v472_v62 = vand.u32 4294901760, %v2402_v54  ;;  %v424_v0 = vand.u32 4294901760, %v423_v55 }
  0x1c   : > { %2069 = vmatprep.subr.mxu1 %v630_v33  ;;  %v453_v1 = vsub.f32 %v2392_v48, %v452_v56  ;;  %v2425_v2 = vsub.f32 %v322_v49, %v2408_v57  ;;  %v2428_v6 = vsub.f32 %v325_v50, %v2410_v58  ;;  %v434_v17 = vand.u32 4294901760, %v433_v59  ;;  %v296_v50 = vld [vmem:[%s2339_s11 + $0x70] sm:$0xff] }
  0x1d   : > { %2070 = vmatpush3.msra.mxu1 %v630_v33  ;;  %v444_v18 = vand.u32 4294901760, %v443_v60  ;;  %v463_v19 = vsub.f32 %v2399_v53, %v462_v61  ;;  %v473_v20 = vsub.f32 %v2402_v54, %v472_v62  ;;  %2039 = vmatprep.mubr.f32.mxu0 %v424_v0  ;;  %v328_v24 = vsel %vm302_vm0, %v290_v63, 0 }
  0x1e   : > { %2072 = vmatmul.mubr.f32.vlgmr.msra.gmra.mxu1 %v2364_v34  ;;  %v482_v22 = vand.u32 4294901760, %v2425_v2  ;;  %v492_v23 = vand.u32 4294901760, %v2428_v6  ;;  %2040 = vmatmul.mubr.f32.vlgmr.msra.gmra.mxu0 %v434_v17  ;;  %v454_v27 = vand.u32 4294901760, %v453_v1  ;;  %v2445_v29 = vand.u32 4294901760, %v328_v24 }
  0x1f   : > { %2127 = vmatprep.subr.mxu1 %v2291_v3  ;;  %v464_v28 = vand.u32 4294901760, %v463_v19  ;;  %v331_v30 = vsel %vm302_vm0, %v291_v16, 0  ;;  %2096 = vmatpush3.msra.mxu0 %v2304_v8  ;;  %v474_v31 = vand.u32 4294901760, %v473_v20  ;;  %v334_v37 = vsel %vm302_vm0, %v292_v21, 0 }
  0x20   : > { %2128 = vmatpush3.msra.mxu1 %v2291_v3  ;;  %v483_v33 = vsub.f32 %v2425_v2, %v482_v22  ;;  %v2453_v36 = vand.u32 4294901760, %v331_v30  ;;  %2042 = vmatprep.mubr.f32.mxu0 %v444_v18  ;;  %v2459_v41 = vsub.f32 %v328_v24, %v2445_v29  ;;  %v2461_v42 = vand.u32 4294901760, %v334_v37  ;;  %v297_v18 = vld [vmem:[%s2339_s11 + $0x78] sm:$0xff] }
  0x21   : > { %2074 = vmatprep.mubr.f32.mxu1 %v2366_v35  ;;  %v337_v8 = vsel %vm302_vm0, %v293_v25, 0  ;;  %v340_v49 = vsel %vm302_vm0, %v294_v26, 0  ;;  %2097 = vmatprep.subr.mxu0 %v2307_v9  ;;  %v493_v59 = vsub.f32 %v2428_v6, %v492_v23  ;;  %v343_v17 = vsel %vm302_vm0, %v295_v38, 0 }
  0x22   : > { %2075 = vmatmul.mubr.f32.gmra.mxu1 %v2375_v40  ;;  %v484_v55 = vand.u32 4294901760, %v483_v33  ;;  %v2472_v60 = vsub.f32 %v331_v30, %v2453_v36  ;;  %v2474_v63 = vand.u32 4294901760, %v337_v8  ;;  %2043 = vmatmul.mubr.f32.gmra.mxu0 %v454_v27  ;;  %v502_v0 = vand.u32 4294901760, %v2459_v41 }
  0x23   : > { %2077 = vmatprep.mubr.f32.mxu1 %v2386_v45  ;;  %v2479_v1 = vsub.f32 %v334_v37, %v2461_v42  ;;  %v2481_v16 = vand.u32 4294901760, %v340_v49  ;;  %2045 = vmatprep.mubr.f32.mxu0 %v464_v28  ;;  %v2490_v21 = vand.u32 4294901760, %v343_v17  ;;  %v346_v24 = vsel %vm302_vm0, %v296_v50, 0 }
  0x24   : > { %2098 = vmatpush3.msra.mxu0 %v2307_v9  ;;  %v512_v19 = vand.u32 4294901760, %v2472_v60  ;;  %v2488_v20 = vsub.f32 %v337_v8, %v2474_v63  ;;  %2129 = vmatprep.subr.mxu1 %v2293_v4  ;;  %v503_v25 = vsub.f32 %v2459_v41, %v502_v0  ;;  %v2502_v27 = vand.u32 4294901760, %v346_v24 }
  0x25   : > { %2099 = vmatprep.subr.mxu0 %v2310_v10  ;;  %v522_v26 = vand.u32 4294901760, %v2479_v1  ;;  %v2500_v9 = vsub.f32 %v340_v49, %v2481_v16  ;;  %v494_v28 = vand.u32 4294901760, %v493_v59  ;;  %v349_v30 = vsel %vm302_vm0, %v297_v18, 0  ;;  %2130 = vmatpush3.msra.mxu1 %v2293_v4 }
  0x26   : > { %2078 = vmatmul.mubr.f32.gmra.mxu1 %v2388_v46  ;;  %2100 = vmatpush3.msra.mxu0 %v2310_v10  ;;  %v504_v33 = vand.u32 4294901760, %v503_v25  ;;  %v513_v37 = vsub.f32 %v2472_v60, %v512_v19  ;;  %v532_v38 = vand.u32 4294901760, %v2488_v20  ;;  %v2513_v8 = vsub.f32 %v343_v17, %v2490_v21 }
  0x27   : > { %2046 = vmatmul.mubr.f32.gmra.mxu0 %v474_v31  ;;  %2080 = vmatprep.mubr.f32.mxu1 %v2408_v57  ;;  %v523_v10 = vsub.f32 %v2479_v1, %v522_v26  ;;  %v542_v31 = vand.u32 4294901760, %v2500_v9  ;;  %v2521_v49 = vsub.f32 %v346_v24, %v2502_v27  ;;  %v2523_v50 = vand.u32 4294901760, %v349_v30 }
  0x28   : > { %2048 = vmatprep.mubr.f32.mxu0 %v484_v55  ;;  %2131 = vmatprep.subr.mxu1 %v2295_v5  ;;  %v514_v55 = vand.u32 4294901760, %v513_v37  ;;  %v533_v59 = vsub.f32 %v2488_v20, %v532_v38  ;;  %v552_v17 = vand.u32 4294901760, %v2513_v8 }
  0x29   : > { %2101 = vmatprep.subr.mxu0 %v2316_v11  ;;  %v2535_v18 = vsub.f32 %v349_v30, %v2523_v50  ;;  %2132 = vmatpush3.msra.mxu1 %v2295_v5  ;;  %v524_v24 = vand.u32 4294901760, %v523_v10  ;;  %v562_v25 = vand.u32 4294901760, %v2521_v49 }
  0x2a   : > { %2081 = vmatmul.mubr.f32.gmra.mxu1 %v2410_v58  ;;  %2102 = vmatpush3.msra.mxu0 %v2316_v11  ;;  %v543_v11 = vsub.f32 %v2500_v9, %v542_v31  ;;  %v553_v30 = vsub.f32 %v2513_v8, %v552_v17 }
  0x2b   : > { %2049 = vmatmul.mubr.f32.gmra.mxu0 %v494_v28  ;;  %2083 = vmatprep.mubr.f32.mxu1 %v2445_v29  ;;  %v534_v28 = vand.u32 4294901760, %v533_v59  ;;  %v563_v10 = vsub.f32 %v2521_v49, %v562_v25 }
  0x2c   : > { %2051 = vmatprep.mubr.f32.mxu0 %v504_v33  ;;  %2133 = vmatprep.subr.mxu1 %v2300_v7  ;;  %v572_v33 = vand.u32 4294901760, %v2535_v18  ;;  %v544_v37 = vand.u32 4294901760, %v543_v11 }
  0x2d   : > { %2159 = vmatprep.subr.mxu0 %v2319_v12  ;;  %2134 = vmatpush3.msra.mxu1 %v2300_v7 }
  0x2e   : > { %2084 = vmatmul.mubr.f32.gmra.mxu1 %v2453_v36  ;;  %2191 = vmatprep.subr.mxu1 %v2291_v3  ;;  %v573_v59 = vsub.f32 %v2535_v18, %v572_v33 }
  0x2f   : > { %2052 = vmatmul.mubr.f32.gmra.mxu0 %v514_v55  ;;  %2086 = vmatprep.mubr.f32.mxu1 %v2461_v42  ;;  %v554_v55 = vand.u32 4294901760, %v553_v30 }
  0x30   : > { %2054 = vmatprep.mubr.f32.mxu0 %v524_v24  ;;  %v564_v24 = vand.u32 4294901760, %v563_v10  ;;  %v574_v11 = vand.u32 4294901760, %v573_v59 }
  0x32   : > { %2087 = vmatmul.mubr.f32.gmra.mxu1 %v2474_v63 }
  0x33   : > { %2055 = vmatmul.mubr.f32.gmra.mxu0 %v534_v28  ;;  %2089 = vmatprep.mubr.f32.mxu1 %v2481_v16 }
  0x34   : > { %2057 = vmatprep.mubr.f32.mxu0 %v544_v37 }
  0x36   : > { %2090 = vmatmul.mubr.f32.gmra.mxu1 %v2490_v21 }
  0x37   : > { %2058 = vmatmul.mubr.f32.gmra.mxu0 %v554_v55  ;;  %2092 = vmatprep.mubr.f32.mxu1 %v2502_v27 }
  0x38   : > { %2060 = vmatprep.mubr.f32.mxu0 %v564_v24 }
  0x3a   : > { %2093 = vmatmul.mubr.f32.gmra.mxu1 %v2523_v50 }
  0x3b   : > { %2061 = vmatmul.mubr.f32.gmra.mxu0 %v574_v11  ;;  %2135 = vmatprep.mubr.f32.mxu1 %v422_v47 }
  0x3c   : > { %2103 = vmatprep.mubr.f32.mxu0 %v2372_v39 }
  0x3e   : > { %2136 = vmatmul.mubr.f32.vlgmr.msra.gmra.mxu1 %v432_v51 }
  0x3f   : > { %2104 = vmatmul.mubr.f32.vlgmr.msra.gmra.mxu0 %v2381_v43  ;;  %2192 = vmatpush3.msra.mxu1 %v2291_v3 }
  0x40   : > { %2160 = vmatpush3.msra.mxu0 %v2319_v12  ;;  %2106 = vmatprep.mubr.f32.mxu0 %v2384_v44 }
  0x41   : > { %2138 = vmatprep.mubr.f32.mxu1 %v442_v52  ;;  %2161 = vmatprep.subr.mxu0 %v2323_v13 }
  0x42   : > { %2139 = vmatmul.mubr.f32.gmra.mxu1 %v452_v56  ;;  %2162 = vmatpush3.msra.mxu0 %v2323_v13 }
  0x43   : > { %2107 = vmatmul.mubr.f32.gmra.mxu0 %v2392_v48  ;;  %2141 = vmatprep.mubr.f32.mxu1 %v462_v61 }
  0x44   : > { %2109 = vmatprep.mubr.f32.mxu0 %v2399_v53  ;;  %2193 = vmatprep.subr.mxu1 %v2293_v4 }
  0x45   : > { %2194 = vmatpush3.msra.mxu1 %v2293_v4  ;;  %2163 = vmatprep.subr.mxu0 %v2326_v14 }
  0x46   : > { %2142 = vmatmul.mubr.f32.gmra.mxu1 %v472_v62  ;;  %2164 = vmatpush3.msra.mxu0 %v2326_v14 }
  0x47   : > { %2110 = vmatmul.mubr.f32.gmra.mxu0 %v2402_v54  ;;  %2144 = vmatprep.mubr.f32.mxu1 %v482_v22 }
  0x48   : > { %2112 = vmatprep.mubr.f32.mxu0 %v2425_v2  ;;  %2195 = vmatprep.subr.mxu1 %v2295_v5 }
  0x49   : > { %2196 = vmatpush3.msra.mxu1 %v2295_v5  ;;  %2165 = vmatprep.subr.mxu0 %v2333_v15 }
  0x4a   : > { %2145 = vmatmul.mubr.f32.gmra.mxu1 %v492_v23  ;;  %2166 = vmatpush3.msra.mxu0 %v2333_v15 }
  0x4b   : > { %2113 = vmatmul.mubr.f32.gmra.mxu0 %v2428_v6  ;;  %2147 = vmatprep.mubr.f32.mxu1 %v502_v0 }
  0x4c   : > { %2115 = vmatprep.mubr.f32.mxu0 %v2459_v41  ;;  %2197 = vmatprep.subr.mxu1 %v2300_v7 }
  0x4d   : > { %2198 = vmatpush3.msra.mxu1 %v2300_v7 }
  0x4e   : > { %2148 = vmatmul.mubr.f32.gmra.mxu1 %v512_v19 }
  0x4f   : > { %2116 = vmatmul.mubr.f32.gmra.mxu0 %v2472_v60  ;;  %2150 = vmatprep.mubr.f32.mxu1 %v522_v26 }
  0x50   : > { %2118 = vmatprep.mubr.f32.mxu0 %v2479_v1 }
  0x52   : > { %2151 = vmatmul.mubr.f32.gmra.mxu1 %v532_v38 }
  0x53   : > { %2119 = vmatmul.mubr.f32.gmra.mxu0 %v2488_v20  ;;  %2153 = vmatprep.mubr.f32.mxu1 %v542_v31 }
  0x54   : > { %2121 = vmatprep.mubr.f32.mxu0 %v2500_v9 }
  0x56   : > { %2154 = vmatmul.mubr.f32.gmra.mxu1 %v552_v17 }
  0x57   : > { %2122 = vmatmul.mubr.f32.gmra.mxu0 %v2513_v8  ;;  %2156 = vmatprep.mubr.f32.mxu1 %v562_v25 }
  0x58   : > { %2124 = vmatprep.mubr.f32.mxu0 %v2521_v49 }
  0x5a   : > { %2157 = vmatmul.mubr.f32.gmra.mxu1 %v572_v33 }
  0x5b   : > { %2125 = vmatmul.mubr.f32.gmra.mxu0 %v2535_v18  ;;  %2199 = vmatprep.mubr.f32.mxu1 %v2361_v32 }
  0x5c   : > { %2167 = vmatprep.mubr.f32.mxu0 %v2361_v32 }
  0x5e   : > { %2200 = vmatmul.mubr.f32.vlgmr.msra.gmra.mxu1 %v2364_v34 }
  0x5f   : > { %2168 = vmatmul.mubr.f32.vlgmr.msra.gmra.mxu0 %v2364_v34  ;;  %2202 = vmatprep.mubr.f32.mxu1 %v2366_v35 }
  0x60   : > { %2170 = vmatprep.mubr.f32.mxu0 %v2366_v35 }
  0x62   : > { %2203 = vmatmul.mubr.f32.gmra.mxu1 %v2375_v40 }
  0x63   : > { %2171 = vmatmul.mubr.f32.gmra.mxu0 %v2375_v40  ;;  %2205 = vmatprep.mubr.f32.mxu1 %v2386_v45 }
  0x64   : > { %2173 = vmatprep.mubr.f32.mxu0 %v2386_v45 }
  0x66   : > { %2206 = vmatmul.mubr.f32.gmra.mxu1 %v2388_v46 }
  0x67   : > { %2174 = vmatmul.mubr.f32.gmra.mxu0 %v2388_v46  ;;  %2208 = vmatprep.mubr.f32.mxu1 %v2408_v57 }
  0x68   : > { %2176 = vmatprep.mubr.f32.mxu0 %v2408_v57 }
  0x6a   : > { %2209 = vmatmul.mubr.f32.gmra.mxu1 %v2410_v58 }
  0x6b   : > { %2177 = vmatmul.mubr.f32.gmra.mxu0 %v2410_v58  ;;  %2211 = vmatprep.mubr.f32.mxu1 %v2445_v29 }
  0x6c   : > { %2179 = vmatprep.mubr.f32.mxu0 %v2445_v29 }
  0x6e   : > { %2212 = vmatmul.mubr.f32.gmra.mxu1 %v2453_v36 }
  0x6f   : > { %2180 = vmatmul.mubr.f32.gmra.mxu0 %v2453_v36  ;;  %2214 = vmatprep.mubr.f32.mxu1 %v2461_v42 }
  0x70   : > { %2182 = vmatprep.mubr.f32.mxu0 %v2461_v42 }
  0x72   : > { %2215 = vmatmul.mubr.f32.gmra.mxu1 %v2474_v63 }
  0x73   : > { %2183 = vmatmul.mubr.f32.gmra.mxu0 %v2474_v63  ;;  %2217 = vmatprep.mubr.f32.mxu1 %v2481_v16 }
  0x74   : > { %2185 = vmatprep.mubr.f32.mxu0 %v2481_v16 }
  0x76   : > { %2218 = vmatmul.mubr.f32.gmra.mxu1 %v2490_v21 }
  0x77   : > { %2186 = vmatmul.mubr.f32.gmra.mxu0 %v2490_v21  ;;  %2220 = vmatprep.mubr.f32.mxu1 %v2502_v27 }
  0x78   : > { %2188 = vmatprep.mubr.f32.mxu0 %v2502_v27 }
  0x7a   : > { %2221 = vmatmul.mubr.f32.gmra.mxu1 %v2523_v50 }
  0x7b   : > { %2189 = vmatmul.mubr.f32.gmra.mxu0 %v2523_v50 }
  0xde   : > { %v2073_v3 = vpop.f32.mrf.mxu1  ;;  %v2041_v4 = vpop.f32.mrf.mxu0 }
  0xdf   : > { %v674_v37 = vadd.f32 %v2073_v3, %v2041_v4 }
  0xe0   : > { %v667_v5 = vpop.f32.mrf.mxu1  ;;  %v426_v7 = vpop.f32.mrf.mxu0 }
  0xe1   : > { %v668_v59 = vadd.f32 %v667_v5, %v426_v7 }
  0xe2   : > { %v2076_v12 = vpop.f32.mrf.mxu1  ;;  %v2044_v13 = vpop.f32.mrf.mxu0 }
  0xe4   : > { %v679_v14 = vpop.f32.mrf.mxu1  ;;  %v446_v15 = vpop.f32.mrf.mxu0 }
  0xe6   : > { %v2657_v32 = vpop.f32.mrf.mxu1 }
  0xe7   : > { %v2659_v34 = vpop.f32.mrf.mxu0 }
  0xe8   : > { %v2661_v35 = vpop.f32.mrf.mxu1 }
  0xe9   : > { %v2663_v39 = vpop.f32.mrf.mxu0 }
  0xea   : > { %v2665_v40 = vpop.f32.mrf.mxu1 }
  0xeb   : > { %v2667_v43 = vpop.f32.mrf.mxu0 }
  0xec   : > { %v2669_v44 = vpop.f32.mrf.mxu1 }
  0xed   : > { %v2671_v45 = vpop.f32.mrf.mxu0 }
  0xee   : > { %v2673_v46 = vpop.f32.mrf.mxu1 }
  0xef   : > { %v2675_v47 = vpop.f32.mrf.mxu0 }
  0xf0   : > { %v2677_v48 = vpop.f32.mrf.mxu1 }
  0xf1   : > { %v2679_v51 = vpop.f32.mrf.mxu0 }
  0xf2   : > { %v2681_v52 = vpop.f32.mrf.mxu1 }
  0xf3   : > { %v2683_v53 = vpop.f32.mrf.mxu0 }
  0xf4   : > { %v2685_v54 = vpop.f32.mrf.mxu1 }
  0xf5   : > { %v2687_v56 = vpop.f32.mrf.mxu0 }
  0xf6   : > { %v2689_v57 = vpop.f32.mrf.mxu1 }
  0xf7   : > { %v2691_v58 = vpop.f32.mrf.mxu0 }
  0xf8   : > { %v2693_v61 = vpop.f32.mrf.mxu1 }
  0xf9   : > { %v2695_v62 = vpop.f32.mrf.mxu0 }
  0xfa   : > { %v2697_v2 = vpop.f32.mrf.mxu1 }
  0xfb   : > { %3032 = vst [vmem:[#allocation2_spill] sm:$0xff] %v2697_v2  ;;  %v2699_v6 = vpop.f32.mrf.mxu0 }
  0xfc   : > { %3033 = vst [vmem:[#allocation3_spill] sm:$0xff] %v2699_v6  ;;  %v2701_v22 = vpop.f32.mrf.mxu1  ;;  %v680_v6 = vadd.f32 %v679_v14, %v446_v15  ;;  %v2755_v15 = vld [vmem:[%s3028_s3] ss:$0 sm:$0xff] }
  0xfd   : > { %3034 = vst [vmem:[#allocation4_spill] sm:$0xff] %v2701_v22  ;;  %v2703_v23 = vpop.f32.mrf.mxu0 }
  0xfe   : > { %3035 = vst [vmem:[#allocation5_spill] sm:$0xff] %v2703_v23  ;;  %v2137_v29 = vpop.f32.mrf.mxu1  ;;  %v686_v23 = vadd.f32 %v2076_v12, %v2044_v13  ;;  %v692_v12 = vadd.f32 %v2661_v35, %v2663_v39  ;;  %v710_v35 = vadd.f32 %v2665_v40, %v2667_v43  ;;  %v704_v39 = vadd.f32 %v2669_v44, %v2671_v45 }
  0xff   : > { %v2105_v36 = vpop.f32.mrf.mxu0  ;;  %v722_v40 = vadd.f32 %v2673_v46, %v2675_v47 }
 0x100   : > { %v1019_v41 = vpop.f32.mrf.mxu1  ;;  %v845_v24 = vadd.f32 %v2105_v36, %v674_v37 }
 0x101   : > { %v837_v42 = vpop.f32.mrf.mxu0 }
 0x102   : > { %v2140_v60 = vpop.f32.mrf.mxu1 }
 0x103   : > { %v2108_v63 = vpop.f32.mrf.mxu0 }
 0x104   : > { %v1035_v0 = vpop.f32.mrf.mxu1  ;;  %v859_v3 = vadd.f32 %v2108_v63, %v686_v23 }
 0x105   : > { %v851_v1 = vpop.f32.mrf.mxu0 }
 0x106   : > { %v2705_v16 = vpop.f32.mrf.mxu1  ;;  %v852_v5 = vadd.f32 %v851_v1, %v680_v6  ;;  %v1044_v23 = vadd.f32 %v2140_v60, %v859_v3  ;;  %v2760_v6 = vld [vmem:[%s3027_s2] ss:$0 sm:$0xff] }
 0x107   : > { %v2111_v19 = vpop.f32.mrf.mxu0 }
 0x108   : > { %v2707_v20 = vpop.f32.mrf.mxu1 }
 0x109   : > { %v865_v21 = vpop.f32.mrf.mxu0 }
 0x10a   : > { %v2709_v26 = vpop.f32.mrf.mxu1 }
 0x10b   : > { %v2114_v9 = vpop.f32.mrf.mxu0 }
 0x10c   : > { %v2711_v27 = vpop.f32.mrf.mxu1  ;;  %v887_v44 = vadd.f32 %v2114_v9, %v710_v35 }
 0x10d   : > { %v2713_v38 = vpop.f32.mrf.mxu0 }
 0x10e   : > { %v2715_v8 = vpop.f32.mrf.mxu1 }
 0x10f   : > { %v2717_v31 = vpop.f32.mrf.mxu0 }
 0x110   : > { %v2719_v49 = vpop.f32.mrf.mxu1 }
 0x111   : > { %v2721_v50 = vpop.f32.mrf.mxu0 }
 0x112   : > { %v2723_v17 = vpop.f32.mrf.mxu1 }
 0x113   : > { %v2725_v18 = vpop.f32.mrf.mxu0 }
 0x114   : > { %v2727_v25 = vpop.f32.mrf.mxu1 }
 0x115   : > { %3036 = vst [vmem:[#allocation6_spill] sm:$0xff] %v2727_v25  ;;  %v2729_v28 = vpop.f32.mrf.mxu0  ;;  %v838_v25 = vadd.f32 %v837_v42, %v668_v59  ;;  %v866_v42 = vadd.f32 %v865_v21, %v692_v12  ;;  %v901_v12 = vadd.f32 %v2717_v31, %v722_v40 }
 0x116   : > { %v2731_v30 = vpop.f32.mrf.mxu1 }
 0x117   : > { %3037 = vst [vmem:[#allocation7_spill] sm:$0xff] %v2731_v30  ;;  %v2733_v33 = vpop.f32.mrf.mxu0  ;;  %v1020_v36 = vadd.f32 %v1019_v41, %v838_v25  ;;  %v1036_v41 = vadd.f32 %v1035_v0, %v852_v5  ;;  %v1052_v3 = vadd.f32 %v2707_v20, %v866_v42  ;;  %v716_v20 = vadd.f32 %v2677_v48, %v2679_v51 }
 0x118   : > { %3038 = vst [vmem:[#allocation8_spill] sm:$0xff] %v2733_v33  ;;  %v2735_v10 = vpop.f32.mrf.mxu1  ;;  %v1028_v33 = vadd.f32 %v2137_v29, %v845_v24  ;;  %v734_v48 = vadd.f32 %v2681_v52, %v2683_v53  ;;  %v728_v53 = vadd.f32 %v2685_v54, %v2687_v56  ;;  %v746_v54 = vadd.f32 %v2689_v57, %v2691_v58 }
 0x119   : > { %3039 = vst [vmem:[#allocation9_spill] sm:$0xff] %v2735_v10  ;;  %v2737_v55 = vpop.f32.mrf.mxu0  ;;  %v698_v10 = vadd.f32 %v2657_v32, %v2659_v34  ;;  %v894_v51 = vadd.f32 %v2721_v50, %v716_v20  ;;  %v1092_v50 = vadd.f32 %v2715_v8, %v901_v12  ;;  %v740_v58 = vadd.f32 %v2693_v61, %v2695_v62  ;;  %v3042_v62 = vld [vmem:[#allocation3_spill] sm:$0xff] }
 0x11a   : > { %v2739_v11 = vpop.f32.mrf.mxu1 }
 0x11b   : > { %3040 = vst [vmem:[#allocation10_spill] sm:$0xff] %v2739_v11  ;;  %v2741_v22 = vpop.f32.mrf.mxu0  ;;  %v873_v13 = vadd.f32 %v2111_v19, %v698_v10  ;;  %v1084_v56 = vadd.f32 %v2719_v49, %v894_v51 }
 0x11c   : > { %v2743_v2 = vpop.f32.mrf.mxu1  ;;  %v3044_v20 = vld [vmem:[#allocation6_spill] sm:$0xff] }
 0x11d   : > { %v2745_v30 = vpop.f32.mrf.mxu0  ;;  %v1060_v43 = vadd.f32 %v2705_v16, %v873_v13 }
 0x11e   : > { %v2201_v4 = vpop.f32.mrf.mxu1 }
 0x11f   : > { %v2169_v7 = vpop.f32.mrf.mxu0 }
 0x120   : > { %v1229_v37 = vadd.f32 %v2169_v7, %v1028_v33  ;;  %v1387_v11 = vpop.f32.mrf.mxu1 }
 0x121   : > { %v1222_v14 = vpop.f32.mrf.mxu0 }
 0x122   : > { %v1394_v29 = vadd.f32 %v2201_v4, %v1229_v37  ;;  %v1223_v32 = vadd.f32 %v1222_v14, %v1020_v36  ;;  %v2204_v34 = vpop.f32.mrf.mxu1  ;;  %v880_v4 = vadd.f32 %v2713_v38, %v704_v39  ;;  %v1076_v38 = vadd.f32 %v2709_v26, %v887_v44 }
 0x123   : > { %v2172_v60 = vpop.f32.mrf.mxu0 }
 0x124   : > { %v1896_v63 = vpack.c.bf16 %v1394_v29, %v1394_v29  ;;  %v1388_v1 = vadd.f32 %v1387_v11, %v1223_v32  ;;  %v1241_v19 = vadd.f32 %v2172_v60, %v1044_v23  ;;  %v1399_v25 = vpop.f32.mrf.mxu1  ;;  %v1578_v33 = vmul.f32 %v2755_v15, %v1394_v29 }
 0x125   : > { %v1234_v45 = vpop.f32.mrf.mxu0  ;;  %v1489_v0 = vmul.f32 %v2760_v6, %v1394_v29 }
 0x126   : > { %1723 = vst.msk [vmem:[%s2769_s19 + $0x4] sm:$0xf] %vm1721_vm1, %v1896_v63  ;;  %v1895_v21 = vpack.c.bf16 %v1388_v1, %v1388_v1  ;;  %v1406_v10 = vadd.f32 %v2204_v34, %v1241_v19  ;;  %v1235_v59 = vadd.f32 %v1234_v45, %v1036_v41  ;;  %v1596_v24 = vsel %vm1504_vm2, %v1578_v33, 0.0  ;;  %v2207_v11 = vpop.f32.mrf.mxu1 }
 0x127   : > { %1597 = vadd.xlane.f32.xlu1 %v1596_v24  ;;  %v1508_v46 = vsel %vm1504_vm2, %v1489_v0, 0.0  ;;  %v2175_v47 = vpop.f32.mrf.mxu0  ;;  %v1488_v16 = vmul.f32 %v2760_v6, %v1388_v1  ;;  %v1577_v39 = vmul.f32 %v2755_v15, %v1388_v1  ;;  %v1068_v41 = vadd.f32 %v2711_v27, %v880_v4  ;;  %v3041_v24 = vld [vmem:[#allocation8_spill] sm:$0xff] }
 0x128   : > { %1722 = vst.msk [vmem:[%s2769_s19] sm:$0xf] %vm1721_vm1, %v1895_v21  ;;  %v1898_v9 = vpack.c.bf16 %v1406_v10, %v1406_v10  ;;  %v1400_v5 = vadd.f32 %v1399_v25, %v1235_v59  ;;  %1509 = vadd.xlane.f32.xlu0 %v1508_v46  ;;  %v1253_v7 = vadd.f32 %v2175_v47, %v1060_v43  ;;  %v1411_v36 = vpop.f32.mrf.mxu1 }
 0x129   : > { %v1491_v37 = vmul.f32 %v2760_v6, %v1406_v10  ;;  %v1246_v13 = vpop.f32.mrf.mxu0  ;;  %v1580_v14 = vmul.f32 %v2755_v15, %v1406_v10  ;;  %v1505_v31 = vsel %vm1504_vm2, %v1488_v16, 0.0  ;;  %v915_v19 = vadd.f32 %v2725_v18, %v734_v48 }
 0x12a   : > { %1725 = vst.msk [vmem:[%s2769_s19 + $0xc] sm:$0xf] %vm1721_vm1, %v1898_v9  ;;  %v1897_v23 = vpack.c.bf16 %v1400_v5, %v1400_v5  ;;  %v1247_v29 = vadd.f32 %v1246_v13, %v1052_v3  ;;  %v2793_v32 = vadd.f32 %v2207_v11, %v1253_v7  ;;  %v2210_v35 = vpop.f32.mrf.mxu1  ;;  %v1490_v44 = vmul.f32 %v2760_v6, %v1400_v5 }
 0x12b   : > { %v1514_v34 = vsel %vm1504_vm2, %v1491_v37, 0.0  ;;  %v2178_v26 = vpop.f32.mrf.mxu0  ;;  %v1602_v27 = vsel %vm1504_vm2, %v1580_v14, 0.0  ;;  %v1593_v18 = vsel %vm1504_vm2, %v1577_v39, 0.0  ;;  %v1579_v45 = vmul.f32 %v2755_v15, %v1400_v5 }
 0x12c   : > { %1515 = vadd.xlane.f32.xlu1 %v1514_v34  ;;  %1724 = vst.msk [vmem:[%s2769_s19 + $0x8] sm:$0xf] %vm1721_vm1, %v1897_v23  ;;  %v1900_v42 = vpack.c.bf16 %v2793_v32, %v2793_v32  ;;  %v2806_v60 = vadd.f32 %v1411_v36, %v1247_v29  ;;  %v1265_v63 = vadd.f32 %v2178_v26, %v1076_v38  ;;  %v1423_v52 = vpop.f32.mrf.mxu1  ;;  %v1511_v16 = vsel %vm1504_vm2, %v1490_v44, 0.0  ;;  %v3045_v23 = vld [vmem:[#allocation5_spill] sm:$0xff]  ;;  %v3046_v29 = vld [vmem:[#allocation4_spill] sm:$0xff]  ;;  %v3049_v44 = vld [vmem:[#allocation10_spill] sm:$0xff] }
 0x12d   : > { %1506 = vadd.xlane.f32.xlu0 %v1505_v31  ;;  %v1258_v1 = vpop.f32.mrf.mxu0  ;;  %v908_v0 = vadd.f32 %v2729_v28, %v728_v53  ;;  %v1108_v49 = vadd.f32 %v2723_v17, %v915_v19  ;;  %v929_v11 = vadd.f32 %v3041_v24, %v746_v54  ;;  %v1493_v28 = vmul.f32 %v2760_v6, %v2793_v32  ;;  %v3043_v17 = vld [vmem:[#allocation2_spill] sm:$0xff]  ;;  %v3048_v53 = vld [vmem:[#allocation9_spill] sm:$0xff] }
 0x12e   : > { %1727 = vst.msk [vmem:[%s2769_s19 + $0x14] sm:$0xf] %vm1721_vm1, %v1900_v42  ;;  %v1899_v25 = vpack.c.bf16 %v2806_v60, %v2806_v60  ;;  %v1259_v33 = vadd.f32 %v1258_v1, %v1068_v41  ;;  %v2817_v40 = vadd.f32 %v2210_v35, %v1265_v63  ;;  %v2213_v43 = vpop.f32.mrf.mxu1  ;;  %v758_v9 = vadd.f32 %v3043_v17, %v3042_v62  ;;  %v3047_v35 = vld [vmem:[#allocation7_spill] sm:$0xff] }
 0x12f   : > { %v2181_v8 = vpop.f32.mrf.mxu0  ;;  %v922_v5 = vadd.f32 %v2737_v55, %v740_v58  ;;  %v1599_v36 = vsel %vm1504_vm2, %v1579_v45, 0.0  ;;  %v1492_v37 = vmul.f32 %v2760_v6, %v2806_v60  ;;  %v1100_v38 = vadd.f32 %v3044_v20, %v908_v0 }
 0x130   : > { %1603 = vadd.xlane.f32.xlu1 %v1602_v27  ;;  %1726 = vst.msk [vmem:[%s2769_s19 + $0x10] sm:$0xf] %vm1721_vm1, %v1899_v25  ;;  %v1902_v21 = vpack.c.bf16 %v2817_v40, %v2817_v40  ;;  %v2830_v10 = vadd.f32 %v1423_v52, %v1259_v33  ;;  %v1277_v59 = vadd.f32 %v2181_v8, %v1092_v50  ;;  %v1435_v57 = vpop.f32.mrf.mxu1  ;;  %v1520_v63 = vsel %vm1504_vm2, %v1493_v28, 0.0 }
 0x131   : > { %1594 = vadd.xlane.f32.xlu0 %v1593_v18  ;;  %v1270_v3 = vpop.f32.mrf.mxu0  ;;  %v752_v34 = vadd.f32 %v3046_v29, %v3045_v23  ;;  %v1124_v48 = vadd.f32 %v3047_v35, %v929_v11  ;;  %v943_v51 = vadd.f32 %v2741_v22, %v758_v9  ;;  %v1582_v31 = vmul.f32 %v2755_v15, %v2793_v32 }
 0x132   : > { %1729 = vst.msk [vmem:[%s2769_s19 + $0x1c] sm:$0xf] %vm1721_vm1, %v1902_v21  ;;  %v1901_v4 = vpack.c.bf16 %v2830_v10, %v2830_v10  ;;  %v1271_v46 = vadd.f32 %v1270_v3, %v1084_v56  ;;  %v2842_v47 = vadd.f32 %v2213_v43, %v1277_v59  ;;  %v2216_v61 = vpop.f32.mrf.mxu1  ;;  %v1116_v50 = vadd.f32 %v3048_v53, %v922_v5 }
 0x133   : > { %v2184_v7 = vpop.f32.mrf.mxu0  ;;  %v1517_v22 = vsel %vm1504_vm2, %v1492_v37, 0.0  ;;  %v1581_v32 = vmul.f32 %v2755_v15, %v2806_v60  ;;  %v936_v1 = vadd.f32 %v2745_v30, %v752_v34  ;;  %v1140_v54 = vadd.f32 %v3049_v44, %v943_v51 }
 0x134   : > { %1512 = vadd.xlane.f32.xlu1 %v1511_v16  ;;  %1728 = vst.msk [vmem:[%s2769_s19 + $0x18] sm:$0xf] %vm1721_vm1, %v1901_v4  ;;  %v1904_v12 = vpack.c.bf16 %v2842_v47, %v2842_v47  ;;  %v1289_v13 = vadd.f32 %v2184_v7, %v1108_v49  ;;  %v2856_v14 = vadd.f32 %v1435_v57, %v1271_v46  ;;  %v1447_v55 = vpop.f32.mrf.mxu1  ;;  %v1608_v8 = vsel %vm1504_vm2, %v1582_v31, 0.0 }
 0x135   : > { %1600 = vadd.xlane.f32.xlu0 %v1599_v36  ;;  %v1282_v26 = vpop.f32.mrf.mxu0  ;;  %v1495_v0 = vmul.f32 %v2760_v6, %v2817_v40  ;;  %v1605_v59 = vsel %vm1504_vm2, %v1581_v32, 0.0  ;;  %v1494_v57 = vmul.f32 %v2760_v6, %v2830_v10  ;;  %v1132_v58 = vadd.f32 %v2743_v2, %v936_v1 }
 0x136   : > { %1731 = vst.msk [vmem:[%s2769_s19 + $0x24] sm:$0xf] %vm1721_vm1, %v1904_v12  ;;  %v1903_v39 = vpack.c.bf16 %v2856_v14, %v2856_v14  ;;  %v1283_v41 = vadd.f32 %v1282_v26, %v1100_v38  ;;  %v2868_v42 = vadd.f32 %v2216_v61, %v1289_v13  ;;  %v2219_v52 = vpop.f32.mrf.mxu1  ;;  %v1584_v4 = vmul.f32 %v2755_v15, %v2817_v40 }
 0x137   : > { %v2187_v19 = vpop.f32.mrf.mxu0  ;;  %v1526_v2 = vsel %vm1504_vm2, %v1495_v0, 0.0  ;;  %v1523_v62 = vsel %vm1504_vm2, %v1494_v57, 0.0  ;;  %v1583_v17 = vmul.f32 %v2755_v15, %v2830_v10  ;;  %v1497_v36 = vmul.f32 %v2760_v6, %v2842_v47 }
 0x138   : > { %1521 = vadd.xlane.f32.xlu1 %v1520_v63  ;;  %1730 = vst.msk [vmem:[%s2769_s19 + $0x20] sm:$0xf] %vm1721_vm1, %v1903_v39  ;;  %v1906_v27 = vpack.c.bf16 %v2868_v42, %v2868_v42  ;;  %v1301_v25 = vadd.f32 %v2187_v19, %v1124_v48  ;;  %v1448_v33 = vadd.f32 %v1447_v55, %v1283_v41  ;;  %v1459_v43 = vpop.f32.mrf.mxu1  ;;  %v1614_v7 = vsel %vm1504_vm2, %v1584_v4, 0.0 }
 0x139   : > { %1518 = vadd.xlane.f32.xlu0 %v1517_v22  ;;  %v1294_v56 = vpop.f32.mrf.mxu0  ;;  %v1611_v37 = vsel %vm1504_vm2, %v1583_v17, 0.0  ;;  %v1496_v20 = vmul.f32 %v2760_v6, %v2856_v14  ;;  %v1532_v10 = vsel %vm1504_vm2, %v1497_v36, 0.0  ;;  %v1586_v38 = vmul.f32 %v2755_v15, %v2842_v47 }
 0x13a   : > { %1733 = vst.msk [vmem:[%s2769_s19 + $0x2c] sm:$0xf] %vm1721_vm1, %v1906_v27  ;;  %v1905_v60 = vpack.c.bf16 %v1448_v33, %v1448_v33  ;;  %v1295_v18 = vadd.f32 %v1294_v56, %v1116_v50  ;;  %v1466_v30 = vadd.f32 %v2219_v52, %v1301_v25  ;;  %v2222_v45 = vpop.f32.mrf.mxu1  ;;  %v1585_v13 = vmul.f32 %v2755_v15, %v2856_v14 }
 0x13b   : > { %v2190_v21 = vpop.f32.mrf.mxu0  ;;  %v1529_v12 = vsel %vm1504_vm2, %v1496_v20, 0.0  ;;  %v1620_v55 = vsel %vm1504_vm2, %v1586_v38, 0.0  ;;  %v1499_v23 = vmul.f32 %v2760_v6, %v2868_v42  ;;  %v1498_v34 = vmul.f32 %v2760_v6, %v1448_v33 }
 0x13c   : > { %1609 = vadd.xlane.f32.xlu1 %v1608_v8  ;;  %1732 = vst.msk [vmem:[%s2769_s19 + $0x28] sm:$0xf] %vm1721_vm1, %v1905_v60  ;;  %v1908_v49 = vpack.c.bf16 %v1466_v30, %v1466_v30  ;;  %v1313_v24 = vadd.f32 %v2190_v21, %v1140_v54  ;;  %v1460_v11 = vadd.f32 %v1459_v43, %v1295_v18  ;;  %v1471_v28 = vpop.f32.mrf.mxu1  ;;  %v1617_v29 = vsel %vm1504_vm2, %v1585_v13, 0.0 }
 0x13d   : > { %1606 = vadd.xlane.f32.xlu0 %v1605_v59  ;;  %v1306_v3 = vpop.f32.mrf.mxu0  ;;  %v1538_v47 = vsel %vm1504_vm2, %v1499_v23, 0.0  ;;  %v1588_v35 = vmul.f32 %v2755_v15, %v2868_v42  ;;  %v1535_v14 = vsel %vm1504_vm2, %v1498_v34, 0.0  ;;  %v1587_v48 = vmul.f32 %v2755_v15, %v1448_v33 }
 0x13e   : > { %1735 = vst.msk [vmem:[%s2769_s19 + $0x34] sm:$0xf] %vm1721_vm1, %v1908_v49  ;;  %v1907_v46 = vpack.c.bf16 %v1460_v11, %v1460_v11  ;;  %v1307_v16 = vadd.f32 %v1306_v3, %v1132_v58  ;;  %v1478_v61 = vadd.f32 %v2222_v45, %v1313_v24  ;;  %v1501_v26 = vmul.f32 %v2760_v6, %v1466_v30 }
 0x13f   : > { %v1626_v51 = vsel %vm1504_vm2, %v1588_v35, 0.0  ;;  %v1623_v31 = vsel %vm1504_vm2, %v1587_v48, 0.0  ;;  %v1500_v39 = vmul.f32 %v2760_v6, %v1460_v11  ;;  %v1590_v42 = vmul.f32 %v2755_v15, %v1466_v30 }
 0x140   : > { %1527 = vadd.xlane.f32.xlu1 %v1526_v2  ;;  %1734 = vst.msk [vmem:[%s2769_s19 + $0x30] sm:$0xf] %vm1721_vm1, %v1907_v46  ;;  %v1910_v9 = vpack.c.bf16 %v1478_v61, %v1478_v61  ;;  %v1472_v5 = vadd.f32 %v1471_v28, %v1307_v16  ;;  %v1544_v41 = vsel %vm1504_vm2, %v1501_v26, 0.0  ;;  %v1589_v52 = vmul.f32 %v2755_v15, %v1460_v11 }
 0x141   : > { %1524 = vadd.xlane.f32.xlu0 %v1523_v62  ;;  %v1541_v63 = vsel %vm1504_vm2, %v1500_v39, 0.0  ;;  %v1632_v53 = vsel %vm1504_vm2, %v1590_v42, 0.0  ;;  %v1503_v50 = vmul.f32 %v2760_v6, %v1478_v61  ;;  %v1592_v1 = vmul.f32 %v2755_v15, %v1478_v61 }
 0x142   : > { %1737 = vst.msk [vmem:[%s2769_s19 + $0x3c] sm:$0xf] %vm1721_vm1, %v1910_v9  ;;  %v1909_v40 = vpack.c.bf16 %v1472_v5, %v1472_v5  ;;  %v1629_v19 = vsel %vm1504_vm2, %v1589_v52, 0.0  ;;  %v1502_v22 = vmul.f32 %v2760_v6, %v1472_v5  ;;  %v1591_v25 = vmul.f32 %v2755_v15, %v1472_v5 }
 0x143   : > { %v1550_v32 = vsel %vm1504_vm2, %v1503_v50, 0.0  ;;  %v1638_v33 = vsel %vm1504_vm2, %v1592_v1, 0.0 }
 0x144   : > { %1615 = vadd.xlane.f32.xlu1 %v1614_v7  ;;  %1736 = vst.msk [vmem:[%s2769_s19 + $0x38] sm:$0xf] %vm1721_vm1, %v1909_v40  ;;  %v1547_v27 = vsel %vm1504_vm2, %v1502_v22, 0.0  ;;  %v1635_v43 = vsel %vm1504_vm2, %v1591_v25, 0.0 }
 0x145   : > { %1612 = vadd.xlane.f32.xlu0 %v1611_v37 }
 0x148   : > { %1533 = vadd.xlane.f32.xlu1 %v1532_v10 }
 0x149   : > { %1530 = vadd.xlane.f32.xlu0 %v1529_v12 }
 0x14c   : > { %1621 = vadd.xlane.f32.xlu1 %v1620_v55 }
 0x14d   : > { %1618 = vadd.xlane.f32.xlu0 %v1617_v29 }
 0x150   : > { %1539 = vadd.xlane.f32.xlu1 %v1538_v47 }
 0x151   : > { %1536 = vadd.xlane.f32.xlu0 %v1535_v14 }
 0x154   : > { %1627 = vadd.xlane.f32.xlu1 %v1626_v51 }
 0x155   : > { %1624 = vadd.xlane.f32.xlu0 %v1623_v31 }
 0x158   : > { %1545 = vadd.xlane.f32.xlu1 %v1544_v41 }
 0x159   : > { %1542 = vadd.xlane.f32.xlu0 %v1541_v63 }
 0x15c   : > { %1633 = vadd.xlane.f32.xlu1 %v1632_v53 }
 0x15d   : > { %1630 = vadd.xlane.f32.xlu0 %v1629_v19 }
 0x160   : > { %1551 = vadd.xlane.f32.xlu1 %v1550_v32 }
 0x161   : > { %1548 = vadd.xlane.f32.xlu0 %v1547_v27 }
 0x164   : > { %1639 = vadd.xlane.f32.xlu1 %v1638_v33 }
 0x165   : > { %1636 = vadd.xlane.f32.xlu0 %v1635_v43 }
 0x1b0   : > { %v1598_v15 = vpop.xlane.xlu1 %1597 }
 0x1b1   : > { %1642 = vst.msk [vmem:[%s2950_s23 + $0x8] sm:$0xff] %vm1553_vm3, %v1598_v15  ;;  %v1510_v6 = vpop.xlane.xlu0 %1509 }
 0x1b2   : > { %1555 = vst.msk [vmem:[%s2956_s26 + $0x8] sm:$0xff] %vm1553_vm3, %v1510_v6 }
 0x1b5   : > { %v1516_v44 = vpop.xlane.xlu1 %1515 }
 0x1b6   : > { %1557 = vst.msk [vmem:[%s2956_s26 + $0x18] sm:$0xff] %vm1553_vm3, %v1516_v44  ;;  %v1507_v54 = vpop.xlane.xlu0 %1506 }
 0x1b7   : > { %1554 = vst.msk [vmem:[%s2956_s26] sm:$0xff] %vm1553_vm3, %v1507_v54 }
 0x1b9   : > { %v1604_v56 = vpop.xlane.xlu1 %1603 }
 0x1ba   : > { %1644 = vst.msk [vmem:[%s2950_s23 + $0x18] sm:$0xff] %vm1553_vm3, %v1604_v56  ;;  %v1595_v8 = vpop.xlane.xlu0 %1594 }
 0x1bb   : > { %1641 = vst.msk [vmem:[%s2950_s23] sm:$0xff] %vm1553_vm3, %v1595_v8 }
 0x1bd   : > { %v1513_v60 = vpop.xlane.xlu1 %1512 }
 0x1be   : > { %1556 = vst.msk [vmem:[%s2956_s26 + $0x10] sm:$0xff] %vm1553_vm3, %v1513_v60  ;;  %v1601_v18 = vpop.xlane.xlu0 %1600 }
 0x1bf   : > { %1643 = vst.msk [vmem:[%s2950_s23 + $0x10] sm:$0xff] %vm1553_vm3, %v1601_v18 }
 0x1c1   : > { %v1522_v30 = vpop.xlane.xlu1 %1521 }
 0x1c2   : > { %1559 = vst.msk [vmem:[%s2956_s26 + $0x28] sm:$0xff] %vm1553_vm3, %v1522_v30  ;;  %v1519_v45 = vpop.xlane.xlu0 %1518 }
 0x1c3   : > { %1558 = vst.msk [vmem:[%s2956_s26 + $0x20] sm:$0xff] %vm1553_vm3, %v1519_v45 }
 0x1c5   : > { %v1610_v0 = vpop.xlane.xlu1 %1609 }
 0x1c6   : > { %1646 = vst.msk [vmem:[%s2950_s23 + $0x28] sm:$0xff] %vm1553_vm3, %v1610_v0  ;;  %v1607_v21 = vpop.xlane.xlu0 %1606 }
 0x1c7   : > { %1645 = vst.msk [vmem:[%s2950_s23 + $0x20] sm:$0xff] %vm1553_vm3, %v1607_v21 }
 0x1c9   : > { %v1528_v59 = vpop.xlane.xlu1 %1527 }
 0x1ca   : > { %1561 = vst.msk [vmem:[%s2956_s26 + $0x38] sm:$0xff] %vm1553_vm3, %v1528_v59  ;;  %v1525_v57 = vpop.xlane.xlu0 %1524 }
 0x1cb   : > { %1560 = vst.msk [vmem:[%s2956_s26 + $0x30] sm:$0xff] %vm1553_vm3, %v1525_v57 }
 0x1cd   : > { %v1616_v58 = vpop.xlane.xlu1 %1615 }
 0x1ce   : > { %1648 = vst.msk [vmem:[%s2950_s23 + $0x38] sm:$0xff] %vm1553_vm3, %v1616_v58  ;;  %v1613_v49 = vpop.xlane.xlu0 %1612 }
 0x1cf   : > { %1647 = vst.msk [vmem:[%s2950_s23 + $0x30] sm:$0xff] %vm1553_vm3, %v1613_v49 }
 0x1d1   : > { %v1534_v24 = vpop.xlane.xlu1 %1533 }
 0x1d2   : > { %1563 = vst.msk [vmem:[%s2956_s26 + $0x48] sm:$0xff] %vm1553_vm3, %v1534_v24  ;;  %v1531_v11 = vpop.xlane.xlu0 %1530 }
 0x1d3   : > { %1562 = vst.msk [vmem:[%s2956_s26 + $0x40] sm:$0xff] %vm1553_vm3, %v1531_v11 }
 0x1d5   : > { %v1622_v3 = vpop.xlane.xlu1 %1621 }
 0x1d6   : > { %1650 = vst.msk [vmem:[%s2950_s23 + $0x48] sm:$0xff] %vm1553_vm3, %v1622_v3  ;;  %v1619_v28 = vpop.xlane.xlu0 %1618 }
 0x1d7   : > { %1649 = vst.msk [vmem:[%s2950_s23 + $0x40] sm:$0xff] %vm1553_vm3, %v1619_v28 }
 0x1d9   : > { %v1540_v4 = vpop.xlane.xlu1 %1539 }
 0x1da   : > { %1565 = vst.msk [vmem:[%s2956_s26 + $0x58] sm:$0xff] %vm1553_vm3, %v1540_v4  ;;  %v1537_v46 = vpop.xlane.xlu0 %1536 }
 0x1db   : > { %1564 = vst.msk [vmem:[%s2956_s26 + $0x50] sm:$0xff] %vm1553_vm3, %v1537_v46 }
 0x1dd   : > { %v1628_v16 = vpop.xlane.xlu1 %1627 }
 0x1de   : > { %1652 = vst.msk [vmem:[%s2950_s23 + $0x58] sm:$0xff] %vm1553_vm3, %v1628_v16  ;;  %v1625_v61 = vpop.xlane.xlu0 %1624 }
 0x1df   : > { %1651 = vst.msk [vmem:[%s2950_s23 + $0x50] sm:$0xff] %vm1553_vm3, %v1625_v61 }
 0x1e1   : > { %v1546_v2 = vpop.xlane.xlu1 %1545 }
 0x1e2   : > { %1567 = vst.msk [vmem:[%s2956_s26 + $0x68] sm:$0xff] %vm1553_vm3, %v1546_v2  ;;  %v1543_v62 = vpop.xlane.xlu0 %1542 }
 0x1e3   : > { %1566 = vst.msk [vmem:[%s2956_s26 + $0x60] sm:$0xff] %vm1553_vm3, %v1543_v62 }
 0x1e5   : > { %v1634_v17 = vpop.xlane.xlu1 %1633 }
 0x1e6   : > { %1654 = vst.msk [vmem:[%s2950_s23 + $0x68] sm:$0xff] %vm1553_vm3, %v1634_v17  ;;  %v1631_v9 = vpop.xlane.xlu0 %1630 }
 0x1e7   : > { %1653 = vst.msk [vmem:[%s2950_s23 + $0x60] sm:$0xff] %vm1553_vm3, %v1631_v9 }
 0x1e9   : > { %v1552_v5 = vpop.xlane.xlu1 %1551 }
 0x1ea   : > { %1569 = vst.msk [vmem:[%s2956_s26 + $0x78] sm:$0xff] %vm1553_vm3, %v1552_v5  ;;  %v1549_v40 = vpop.xlane.xlu0 %1548 }
 0x1eb   : > { %1568 = vst.msk [vmem:[%s2956_s26 + $0x70] sm:$0xff] %vm1553_vm3, %v1549_v40 }
 0x1ed   : > { %v1640_v7 = vpop.xlane.xlu1 %1639 }
 0x1ee   : > { %1656 = vst.msk [vmem:[%s2950_s23 + $0x78] sm:$0xff] %vm1553_vm3, %v1640_v7  ;;  %v1637_v36 = vpop.xlane.xlu0 %1636 }
 0x1ef   : > { %1655 = vst.msk [vmem:[%s2950_s23 + $0x70] sm:$0xff] %vm1553_vm3, %v1637_v36 }
 0x1f0 PF: > { %s17_s21 = sadd.s32 1, %s2237_s21  }
 0x1f1   : > { %p14_p4 = scmp.ge.s32.totalorder %s17_s21, 6  }
 0x1f3   :  { %16 = sbr.rel (!%p14_p4) target bundleno = 1 (0x1), region = 90 }

</bundles_post_ra>
